<compile_context>
chip_gen: v6e
topology: v6e:2x2x1
jax: 0.10.0
libtpu: 0.0.40
codegen_flags: <defaults>
</compile_context>

<pallas_src>
import functools

import jax
import jax.numpy as jnp
from jax.experimental import pallas as pl
from jax.experimental.pallas import tpu as pltpu

_LANE = 128
# Only force a >=2-step split (for v7x's 2 TCs) once there is enough data that
# the extra ~0.35 us step overhead is negligible (~2 MiB of f32 = 4096 rows).
_MIN_ROWS_FOR_SPLIT = 4096


def _scale_kernel(x_ref, o_ref, *, val):
    # hot path: single elementwise multiply on the VPU
    # (val is a closed-over Python scalar; weak-type promotion keeps the
    #  multiply in the input dtype, matching the `x * self.val` reference)
    o_ref[...] = x_ref[...] * val


def _vmem_capacity_bytes():
    """Generation-aware physical VMEM size (128 MiB v5e/v6e, 64 MiB v7x)."""
    try:
        return int(pltpu.get_tpu_info().vmem_capacity_bytes)
    except Exception:
        return 64 * 1024 * 1024  # conservative (v7x-sized) fallback


def _choose_block_rows(rows, row_bytes, vmem_cap):
    """Pick a block height (in 128-lane rows) from the VMEM budget."""
    # Keep 2x(in) + 2x(out) double-buffered blocks under ~half of VMEM:
    # block <= VMEM/8  ->  ~8 MiB on v7x, ~16 MiB on v5e/v6e.
    max_block_rows = max(8, (vmem_cap // 8 // row_bytes) // 8 * 8)
    block_rows = min(max_block_rows, rows)
    if rows >= _MIN_ROWS_FOR_SPLIT:
        # Guarantee >=2 balanced grid steps so the "parallel" axis can shard
        # across v7x's two TensorCores (no effect on single-TC v5e/v6e).
        n_steps = max(2, pl.cdiv(rows, block_rows))
        block_rows = ((pl.cdiv(rows, n_steps) + 7) // 8) * 8  # sublane-aligned
    return block_rows


def _scale_tiled_2d(x2d, val):
    """y = x2d * val for a lane-dense (rows, 128) array via a tiled grid."""
    rows, lane = x2d.shape
    itemsize = jnp.dtype(x2d.dtype).itemsize
    vmem_cap = _vmem_capacity_bytes()
    block_rows = _choose_block_rows(rows, lane * itemsize, vmem_cap)
    grid = (pl.cdiv(rows, block_rows),)  # ragged last block handled by Pallas

    block_bytes = block_rows * lane * itemsize
    # 4 double-buffered blocks + headroom, clamped to 3/4 of physical VMEM.
    vmem_limit = min(vmem_cap * 3 // 4, 4 * block_bytes + (8 << 20))

    return pl.pallas_call(
        functools.partial(_scale_kernel, val=val),
        out_shape=jax.ShapeDtypeStruct((rows, lane), x2d.dtype),
        grid=grid,
        in_specs=[pl.BlockSpec((block_rows, lane), lambda i: (i, 0))],
        out_specs=pl.BlockSpec((block_rows, lane), lambda i: (i, 0)),
        compiler_params=pltpu.CompilerParams(
            dimension_semantics=("parallel",),
            vmem_limit_bytes=int(vmem_limit),
        ),
        cost_estimate=pl.CostEstimate(
            flops=rows * lane,
            transcendentals=0,
            bytes_accessed=2 * rows * lane * itemsize,  # read + write
        ),
    )(x2d)


def scale_forward(x, val, *, lane=_LANE):
    """Applies y = x * val using Pallas TPU kernels."""
    orig_shape = x.shape
    total = x.size
    if total == 0:
        return x

    x_flat = x.reshape(total)
    main = (total // lane) * lane  # 128-aligned prefix
    rem = total - main

    parts = []
    if main:
        rows = main // lane
        y_main = _scale_tiled_2d(x_flat[:main].reshape(rows, lane), val)
        parts.append(y_main.reshape(main))
    if rem:
        # <128-element tail: a single full-extent block (exempt from the
        # (8,128) rule), one tiny call -- keeps the hot path unmasked and
        # lane-dense and the VMEM footprint bounded for ragged totals.
        y_rem = pl.pallas_call(
            functools.partial(_scale_kernel, val=val),
            out_shape=jax.ShapeDtypeStruct((1, rem), x.dtype),
        )(x_flat[main:].reshape(1, rem))
        parts.append(y_rem.reshape(rem))

    out_flat = parts[0] if len(parts) == 1 else jnp.concatenate(parts)
    return out_flat.reshape(orig_shape)


if __name__ == "__main__":
    # deterministic "parameter": the constructor value of Scale(val)
    val = 0.5
    key = jax.random.PRNGKey(0)

    # NCHW input, consistent with the surrounding conv-style module
    x = jax.random.normal(key, (2, 4, 16, 16), dtype=jnp.float32)
    y = jax.block_until_ready(scale_forward(x, val))
    assert jnp.allclose(y, x * val, atol=1e-6), "mismatch vs reference"

    # also exercise the ragged (non-128-divisible) path: 258 = 2*128 + 2
    x_r = jax.random.normal(jax.random.PRNGKey(1), (2, 3, 43), dtype=jnp.float32)
    y_r = jax.block_until_ready(scale_forward(x_r, val))
    assert jnp.allclose(y_r, x_r * val, atol=1e-6), "ragged mismatch vs reference"

    print("KERNEL_OK")
</pallas_src>

<mosaic_0001>
module attributes {stable_mosaic.version = 11 : i64} {
  func.func @_scale_kernel(%arg0: i32, %arg1: memref<16x128xf32, #tpu.memory_space<vmem>>, %arg2: memref<16x128xf32, #tpu.memory_space<vmem>>) attributes {dimension_semantics = [#tpu.dimension_semantics<parallel>], iteration_bounds = array<i64: 1>, scalar_prefetch = 0 : i64, scratch_operands = 0 : i64, tpu.core_type = #tpu.core_type<tc>, window_params = [{transform_indices = @transform_0, window_bounds = array<i64: 16, 128>}, {transform_indices = @transform_1, window_bounds = array<i64: 16, 128>}]} {
    %c0 = arith.constant 0 : index
    %c0_0 = arith.constant 0 : index
    %0 = vector.load %arg1[%c0, %c0_0] : memref<16x128xf32, #tpu.memory_space<vmem>>, vector<16x128xf32>
    %cst = arith.constant 5.000000e-01 : f32
    %1 = vector.broadcast %cst : f32 to vector<16x128xf32>
    %2 = arith.mulf %0, %1 : vector<16x128xf32>
    %c0_1 = arith.constant 0 : index
    %c0_2 = arith.constant 0 : index
    %3 = vector.load %arg2[%c0_1, %c0_2] : memref<16x128xf32, #tpu.memory_space<vmem>>, vector<16x128xf32>
    tpu.vector_store %arg2[%c0_1, %c0_2], %2 {strides = array<i32>} : memref<16x128xf32, #tpu.memory_space<vmem>>, vector<16x128xf32>,
    return
  }
  func.func @transform_0(%arg0: i32) -> (i32, i32) {
    %c0_i32 = arith.constant 0 : i32
    %c0_i32_0 = arith.constant 0 : i32
    return %arg0, %c0_i32 : i32, i32
  }
  func.func @transform_1(%arg0: i32) -> (i32, i32) {
    %c0_i32 = arith.constant 0 : i32
    %c0_i32_0 = arith.constant 0 : i32
    return %arg0, %c0_i32 : i32, i32
  }
}

</mosaic_0001>

<bundles_post_ra>
// kernel: tpu_custom_call.1
= control target key start
LH: loop header
LB: loop body
LE: loop exit
PB: predicated region body
PF: predicated region fallthrough
CT: control target
= control target key end

     0   :  { %6 = vsyncpa [#allocation3], 0  ;;  %s114_s0 = inlined_call_operand.hbm [shape: f32[16,128], index: 0, kind: input, shape index: {}]   ;;  %s115_s1 = inlined_call_operand.hbm [shape: f32[16,128], index: 1, kind: output, shape index: {}]  }
   0x1   :  { %7 = vsyncpa [#allocation4], 0  ;;  %s94_s6 = smov [#allocation2]  }
   0x2   :  { %s13_s7 = sshll.u32 %s94_s6, 4  ;;  %s14_s7 = int_to_ptr.vmem [resolvable:$true] %s13_s7 }
   0x3   :  { %s58_s8 = scalar_lea.vmem %s14_s7, 256  ;;  %p63_p1 = scmp.lt.s32.totalorder %s14_s7, %s14_s7 }
   0x4   :  { %p59_p0 = scmp.ne.s32.totalorder %s14_s7, %s58_s8  ;;  %p64_p2 = scmp.lt.s32.totalorder %s58_s8, %s58_s8 }
   0x6   :  { %p65_p3 = por %p64_p2, %p63_p1 }
   0x8   :  { %p66_p4 = pnand %p65_p3, %p59_p0 }
   0xa   :  { %69 = shalt.err (!%p66_p4)
}
   0xb   :  { %s95_s9 = smov 128   ;;  %s96_s10 = smov 8  }
   0xc   :  { %19 = dma.hbm_to_vmem [thread:$0]  %s114_s0, 256, %s14_s7, [#allocation3], %s95_s9, %s95_s9, %s96_s10  }
   0xd   :  { %90 = dma.done.wait [#allocation3], 256  }
   0xe   :  { %91 = vsyncadd [#allocation3], 4294967040  ;;  %s97_s13 = smov [#allocation5]   ;;  %v23_v0 = vld [vmem:[#allocation2] sm:$0xff]  ;;  %v24_v1 = vld [vmem:[#allocation2 + $0x8] sm:$0xff] }
   0xf   :  { %s34_s14 = sshll.u32 %s97_s13, 4  ;;  %v25_v2 = vmul.f32 0.5, %v23_v0  ;;  %v26_v3 = vmul.f32 0.5, %v24_v1  ;;  %s35_s14 = int_to_ptr.vmem [resolvable:$true] %s34_s14 }
  0x10   :  { %s70_s15 = scalar_lea.vmem %s35_s14, 256  ;;  %p75_p6 = scmp.lt.s32.totalorder %s35_s14, %s35_s14 }
  0x11   :  { %27 = vst [vmem:[#allocation5] sm:$0xff] %v25_v2  ;;  %28 = vst [vmem:[#allocation5 + $0x8] sm:$0xff] %v26_v3  ;;  %p71_p5 = scmp.ne.s32.totalorder %s35_s14, %s70_s15  ;;  %p76_p7 = scmp.lt.s32.totalorder %s70_s15, %s70_s15 }
  0x13   :  { %p77_p8 = por %p76_p7, %p75_p6 }
  0x15   :  { %p78_p9 = pnand %p77_p8, %p71_p5 }
  0x17   :  { %81 = shalt.err (!%p78_p9)
}
  0x18   :  { %40 = dma.vmem_to_hbm [thread:$0]  %s35_s14, 256, %s115_s1, [#allocation4], %s95_s9, %s95_s9, %s96_s10  }
  0x19   :  { %92 = dma.done.wait [#allocation4], 256  }
  0x1a   :  { %93 = vsyncadd [#allocation4], 4294967040 }
  0x1b   :  { %44 = vsyncpa [#allocation3], 1 }
  0x1c   :  { %45 = vsyncpa [#allocation4], 1 }

</bundles_post_ra>
